<compile_context>
chip_gen: v7x
topology: tpu7x:2x2x1
jax: 0.10.0
libtpu: 0.0.40
codegen_flags: <defaults>
</compile_context>

<pallas_src>
import jax
import jax.numpy as jnp
from jax.experimental import pallas as pl
from jax.experimental.pallas import tpu as pltpu


def _round_up(x, m):
    return ((x + m - 1) // m) * m


def _disc_kernel(x_ref, w1_ref, b1_ref, w2_ref, b2_ref, o_ref):
    # x_ref: (TB, D)   w1_ref: (D, H)   b1_ref: (1, H)
    # w2_ref: (1, H) lane-dense row     b2_ref: (1,) scalar in SMEM
    # o_ref: (TB, 1)

    # Layer 1 on the MXU, f32 accumulation.
    h = jnp.dot(x_ref[...], w1_ref[...], preferred_element_type=jnp.float32)
    h = h + b1_ref[...]                      # (TB, H) + (1, H) broadcast
    # LeakyReLU(0.1) on the VPU.
    h = jnp.where(h > 0, h, 0.1 * h)

    # Layer 2 (H -> 1): lane-dense multiply + cross-lane reduce (VALU + XLU)
    # instead of pushing an N=1 matmul through the MXU.
    logit = jnp.sum(h * w2_ref[...], axis=-1, keepdims=True) + b2_ref[0]

    # Sigmoid: exp and approx reciprocal both live on the EUP slot.
    o_ref[...] = pl.reciprocal(1.0 + jnp.exp(-logit), approx=True).astype(o_ref.dtype)


def discriminator_forward(x, w1, b1, w2, b2, *, block_b=1024):
    """x: (B, D) f32 -> (B, 1) f32 probabilities."""
    B, D = x.shape
    H = w1.shape[1]
    assert w1.shape == (D, H) and b1.shape == (1, H)
    assert w2.shape == (1, H) and b2.shape == (1,)

    # Batch tile: multiple of 256 (v6e/v7x MXU rows; also 128-aligned for v5e),
    # capped by the (padded) batch.  Default 1024 rows keeps
    # 2 buffers x TB x D x 4B well under the 16/32 MiB scoped-VMEM defaults.
    tb = min(block_b, _round_up(B, 256))
    tb = _round_up(tb, 256)
    b_pad = _round_up(B, tb)
    if b_pad != B:
        x = jnp.pad(x, ((0, b_pad - B), (0, 0)))
    grid = (b_pad // tb,)

    out = pl.pallas_call(
        _disc_kernel,
        out_shape=jax.ShapeDtypeStruct((b_pad, 1), jnp.float32),
        grid=grid,
        in_specs=[
            pl.BlockSpec((tb, D), lambda i: (i, 0)),        # streamed X tiles
            pl.BlockSpec((D, H), lambda i: (0, 0)),          # resident weights
            pl.BlockSpec((1, H), lambda i: (0, 0)),
            pl.BlockSpec((1, H), lambda i: (0, 0)),
            pl.BlockSpec(memory_space=pltpu.MemorySpace.SMEM),  # b2 scalar
        ],
        out_specs=pl.BlockSpec((tb, 1), lambda i: (i, 0)),
        compiler_params=pltpu.CompilerParams(
            dimension_semantics=("parallel",),
        ),
    )(x, w1, b1, w2, b2)

    return out[:B]


def init_params(key, img_dim, hidden=128):
    """Deterministic init mimicking nn.Linear's default U(-1/sqrt(fan_in), +1/sqrt(fan_in))."""
    k1, k2, k3, k4 = jax.random.split(key, 4)
    bound1 = 1.0 / jnp.sqrt(img_dim)
    bound2 = 1.0 / jnp.sqrt(hidden)
    w1 = jax.random.uniform(k1, (img_dim, hidden), jnp.float32, -bound1, bound1)
    b1 = jax.random.uniform(k2, (1, hidden), jnp.float32, -bound1, bound1)
    w2 = jax.random.uniform(k3, (1, hidden), jnp.float32, -bound2, bound2)  # (out, in)
    b2 = jax.random.uniform(k4, (1,), jnp.float32, -bound2, bound2)
    return w1, b1, w2, b2


def reference_forward(x, w1, b1, w2, b2):
    h = x @ w1 + b1
    h = jnp.where(h > 0, h, 0.1 * h)
    logit = jnp.sum(h * w2, axis=-1, keepdims=True) + b2
    return jax.nn.sigmoid(logit)


if __name__ == "__main__":
    key = jax.random.PRNGKey(0)
    kx, kp = jax.random.split(key)

    batch, img_dim = 8, 256          # small shapes; img_dim plays the role of 784
    x = jax.random.normal(kx, (batch, img_dim), jnp.float32)
    w1, b1, w2, b2 = init_params(kp, img_dim)

    out = discriminator_forward(x, w1, b1, w2, b2)
    out = jax.block_until_ready(out)

    ref = reference_forward(x, w1, b1, w2, b2)
    assert out.shape == (batch, 1)
    # approx reciprocal in the sigmoid -> slightly looser tolerance than 1e-5
    assert jnp.allclose(out, ref, atol=2e-3, rtol=2e-3), (out, ref)
    assert bool(jnp.all((out >= 0.0) & (out <= 1.0)))

    print("KERNEL_OK")
</pallas_src>

<mosaic_0001>
module attributes {stable_mosaic.version = 11 : i64} {
  func.func @_disc_kernel(%arg0: i32, %arg1: memref<256x256xf32, #tpu.memory_space<vmem>>, %arg2: memref<256x128xf32, #tpu.memory_space<vmem>>, %arg3: memref<1x128xf32, #tpu.memory_space<vmem>>, %arg4: memref<1x128xf32, #tpu.memory_space<vmem>>, %arg5: memref<1xf32, #tpu.memory_space<smem>>, %arg6: memref<256x1xf32, #tpu.memory_space<vmem>>) attributes {dimension_semantics = [#tpu.dimension_semantics<parallel>], iteration_bounds = array<i64: 1>, scalar_prefetch = 0 : i64, scratch_operands = 0 : i64, tpu.core_type = #tpu.core_type<tc>, window_params = [{transform_indices = @transform_0, window_bounds = array<i64: 256, 256>}, {pipeline_mode = #tpu.pipeline_mode<synchronous>, transform_indices = @transform_1, window_bounds = array<i64: 256, 128>}, {pipeline_mode = #tpu.pipeline_mode<synchronous>, transform_indices = @transform_2, window_bounds = array<i64: 1, 128>}, {pipeline_mode = #tpu.pipeline_mode<synchronous>, transform_indices = @transform_3, window_bounds = array<i64: 1, 128>}, {transform_indices = @transform_4, window_bounds = array<i64: 1>}, {transform_indices = @transform_5, window_bounds = array<i64: 256, 1>}]} {
    %c0 = arith.constant 0 : index
    %c0_0 = arith.constant 0 : index
    %0 = vector.load %arg1[%c0, %c0_0] : memref<256x256xf32, #tpu.memory_space<vmem>>, vector<256x256xf32>
    %c0_1 = arith.constant 0 : index
    %c0_2 = arith.constant 0 : index
    %1 = vector.load %arg2[%c0_1, %c0_2] : memref<256x128xf32, #tpu.memory_space<vmem>>, vector<256x128xf32>
    %cst = arith.constant dense<0.000000e+00> : vector<256x128xf32>
    %2 = tpu.matmul %0, %1, %cst {dimension_numbers = #tpu.dot_dimension_numbers<[1], [0], [0], [1], [0, 0, 1, 1], [], []>} : vector<256x256xf32>, vector<256x128xf32>, vector<256x128xf32> -> vector<256x128xf32>
    %c0_3 = arith.constant 0 : index
    %c0_4 = arith.constant 0 : index
    %3 = vector.load %arg3[%c0_3, %c0_4] : memref<1x128xf32, #tpu.memory_space<vmem>>, vector<1x128xf32>
    %4 = vector.broadcast %3 : vector<1x128xf32> to vector<256x128xf32>
    %5 = arith.addf %2, %4 : vector<256x128xf32>
    %cst_5 = arith.constant 0.000000e+00 : f32
    %6 = vector.broadcast %cst_5 : f32 to vector<256x128xf32>
    %7 = arith.cmpf ogt, %5, %6 : vector<256x128xf32>
    %cst_6 = arith.constant 1.000000e-01 : f32
    %8 = vector.broadcast %cst_6 : f32 to vector<256x128xf32>
    %9 = arith.mulf %8, %5 : vector<256x128xf32>
    %10 = arith.select %7, %5, %9 : vector<256x128xi1>, vector<256x128xf32>
    %c0_7 = arith.constant 0 : index
    %c0_8 = arith.constant 0 : index
    %11 = vector.load %arg4[%c0_7, %c0_8] : memref<1x128xf32, #tpu.memory_space<vmem>>, vector<1x128xf32>
    %12 = vector.broadcast %11 : vector<1x128xf32> to vector<256x128xf32>
    %13 = arith.mulf %10, %12 : vector<256x128xf32>
    %cst_9 = arith.constant dense<0.000000e+00> : vector<256xf32>
    %14 = vector.multi_reduction <add>, %13, %cst_9 [1] : vector<256x128xf32> to vector<256xf32>
    %15 = vector.shape_cast %14 : vector<256xf32> to vector<256x1xf32>
    %c0_10 = arith.constant 0 : index
    %16 = memref.load %arg5[%c0_10] : memref<1xf32, #tpu.memory_space<smem>>
    %17 = vector.broadcast %16 : f32 to vector<256x1xf32>
    %18 = arith.addf %15, %17 : vector<256x1xf32>
    %cst_11 = arith.constant 0.000000e+00 : f32
    %19 = vector.broadcast %cst_11 : f32 to vector<256x1xf32>
    %20 = arith.subf %19, %18 : vector<256x1xf32>
    %21 = math.exp %20 : vector<256x1xf32>
    %cst_12 = arith.constant 1.000000e+00 : f32
    %22 = vector.broadcast %cst_12 : f32 to vector<256x1xf32>
    %23 = arith.addf %22, %21 : vector<256x1xf32>
    %24 = tpu.reciprocal %23 {approx = true} : vector<256x1xf32> -> vector<256x1xf32>
    %c0_13 = arith.constant 0 : index
    %c0_14 = arith.constant 0 : index
    %25 = vector.load %arg6[%c0_13, %c0_14] : memref<256x1xf32, #tpu.memory_space<vmem>>, vector<256x1xf32>
    tpu.vector_store %arg6[%c0_13, %c0_14], %24 {strides = array<i32>} : memref<256x1xf32, #tpu.memory_space<vmem>>, vector<256x1xf32>,
    return
  }
  func.func @transform_0(%arg0: i32) -> (i32, i32) {
    %c0_i32 = arith.constant 0 : i32
    %c0_i32_0 = arith.constant 0 : i32
    return %arg0, %c0_i32 : i32, i32
  }
  func.func @transform_1(%arg0: i32) -> (i32, i32) {
    %c0_i32 = arith.constant 0 : i32
    %c0_i32_0 = arith.constant 0 : i32
    %c0_i32_1 = arith.constant 0 : i32
    return %c0_i32, %c0_i32_0 : i32, i32
  }
  func.func @transform_2(%arg0: i32) -> (i32, i32) {
    %c0_i32 = arith.constant 0 : i32
    %c0_i32_0 = arith.constant 0 : i32
    %c0_i32_1 = arith.constant 0 : i32
    return %c0_i32, %c0_i32_0 : i32, i32
  }
  func.func @transform_3(%arg0: i32) -> (i32, i32) {
    %c0_i32 = arith.constant 0 : i32
    %c0_i32_0 = arith.constant 0 : i32
    %c0_i32_1 = arith.constant 0 : i32
    return %c0_i32, %c0_i32_0 : i32, i32
  }
  func.func @transform_4(%arg0: i32) -> i32 {
    %c0_i32 = arith.constant 0 : i32
    %c0_i32_0 = arith.constant 0 : i32
    return %c0_i32 : i32
  }
  func.func @transform_5(%arg0: i32) -> (i32, i32) {
    %c0_i32 = arith.constant 0 : i32
    %c0_i32_0 = arith.constant 0 : i32
    return %arg0, %c0_i32 : i32, i32
  }
}

</mosaic_0001>

<bundles_post_ra>
// kernel: tpu_custom_call.1
= control target key start
LH: loop header
LB: loop body
LE: loop exit
PB: predicated region body
PF: predicated region fallthrough
CT: control target
= control target key end

     0   :  { %11 = vsyncpa [#allocation4], 0  ;;  %s1406_s0 = inlined_call_operand.hbm [shape: f32[256,256], index: 0, kind: input, shape index: {}]   ;;  %s1407_s1 = inlined_call_operand.hbm [shape: f32[256,128], index: 1, kind: input, shape index: {}]   ;;  %s1408_s2 = inlined_call_operand.vmem [shape: f32[1,128], index: 2, kind: input, shape index: {}]   ;;  %s1409_s3 = inlined_call_operand.vmem [shape: f32[1,128], index: 3, kind: input, shape index: {}]   ;;  %s1410_s4 = inlined_call_operand.<no memory space> [shape: f32[1], index: 4, kind: input, shape index: {}]   ;;  %s1411_s5 = inlined_call_operand.vmem [shape: f32[256,1], index: 5, kind: output, shape index: {}]  }
   0x1   :  { %12 = vsyncpa [#allocation6], 0  ;;  %s1074_s18 = smov [#allocation3]   ;;  %s1026_s22 = scalar_lea.hbm %s1406_s0, 8192 }
   0x2   :  { %s18_s19 = sshll.u32 %s1074_s18, 4  ;;  %p1027_p0 = scmp.ne.s32.totalorder %s1406_s0, %s1026_s22  ;;  %s19_s19 = int_to_ptr.vmem [resolvable:$true] %s18_s19 }
   0x3   :  { %p1030_p1 = scmp.lt.u32.totalorder %s1026_s22, %s1406_s0 }
   0x5   :  { %p1032_p2 = pnand %p1030_p1, %p1027_p0 }
   0x7   :  { %1035 = shalt.err (!%p1032_p2)
}
   0x8   :  { %s1036_s27 = scalar_lea.vmem %s19_s19, 8192  ;;  %p1041_p4 = scmp.lt.s32.totalorder %s19_s19, %s19_s19 }
   0x9   :  { %p1037_p3 = scmp.ne.s32.totalorder %s19_s19, %s1036_s27  ;;  %p1042_p5 = scmp.lt.s32.totalorder %s1036_s27, %s1036_s27 }
   0xb   :  { %p1043_p6 = por %p1042_p5, %p1041_p4 }
   0xd   :  { %p1044_p7 = pnand %p1043_p6, %p1037_p3 }
   0xf   :  { %1047 = shalt.err (!%p1044_p7)
}
  0x10   :  { %s1075_s28 = smov 256   ;;  %s1076_s29 = smov 16  }
  0x11   :  { %24 = dma.hbm_to_vmem [thread:$0]  %s1406_s0, 8192, %s19_s19, [#allocation4], %s1075_s28, %s1075_s28, %s1076_s29  }
  0x12   :  { %s1077_s7 = smov [#allocation5]   ;;  %s1048_s11 = scalar_lea.hbm %s1407_s1, 4096 }
  0x13   :  { %s30_s8 = sshll.u32 %s1077_s7, 4  ;;  %p1049_p8 = scmp.ne.s32.totalorder %s1407_s1, %s1048_s11  ;;  %s31_s8 = int_to_ptr.vmem [resolvable:$true] %s30_s8 }
  0x14   :  { %p1052_p9 = scmp.lt.u32.totalorder %s1048_s11, %s1407_s1 }
  0x16   :  { %p1054_p10 = pnand %p1052_p9, %p1049_p8 }
  0x18   :  { %1057 = shalt.err (!%p1054_p10)
}
  0x19   :  { %s1058_s16 = scalar_lea.vmem %s31_s8, 4096  ;;  %p1063_p12 = scmp.lt.s32.totalorder %s31_s8, %s31_s8 }
  0x1a   :  { %p1059_p11 = scmp.ne.s32.totalorder %s31_s8, %s1058_s16  ;;  %p1064_p13 = scmp.lt.s32.totalorder %s1058_s16, %s1058_s16 }
  0x1c   :  { %p1065_p0 = por %p1064_p13, %p1063_p12 }
  0x1e   :  { %p1066_p1 = pnand %p1065_p0, %p1059_p11 }
  0x20   :  { %1069 = shalt.err (!%p1066_p1)
}
  0x21   :  { %s1078_s0 = smov 128   ;;  %s1079_s17 = smov 8  }
  0x22   :  { %36 = dma.hbm_to_vmem [thread:$0]  %s1407_s1, 4096, %s31_s8, [#allocation6], %s1078_s0, %s1078_s0, %s1079_s17  }
  0x23   :  { %1070 = dma.done.wait [#allocation4], 8192  }
  0x24   :  { %1071 = vsyncadd [#allocation4], 4294959104 }
  0x25   :  { %1072 = dma.done.wait [#allocation6], 4096  }
  0x26   :  { %1073 = vsyncadd [#allocation6], 4294963200  ;;  %v1080_v0 = vmov 0.0|0.0   ;;  %v113_v1 = vld [vmem:[#allocation5] sm:$0xff]  ;;  %v114_v2 = vld [vmem:[#allocation5 + $0x8] sm:$0xff] }
  0x27   :  { %811 = vmatprep.subr.bf16.mxu0 %v1080_v0  ;;  %859 = vmatprep.subr.bf16.mxu1 %v1080_v0  ;;  %v115_v3 = vld [vmem:[#allocation5 + $0x10] sm:$0xff]  ;;  %v812_v4 = vpack.c.bf16 %v114_v2, %v113_v1  ;;  %v116_v5 = vld [vmem:[#allocation5 + $0x18] sm:$0xff]  ;;  %v117_v7 = vld [vmem:[#allocation5 + $0x20] sm:$0xff] }
  0x28   :  { %v815_v6 = vpack.c.bf16 %v116_v5, %v115_v3  ;;  %v118_v8 = vld [vmem:[#allocation5 + $0x28] sm:$0xff]  ;;  %v119_v10 = vld [vmem:[#allocation5 + $0x30] sm:$0xff]  ;;  %v120_v11 = vld [vmem:[#allocation5 + $0x38] sm:$0xff] }
  0x29   :  { %813 = vmatpush1.bf16.msra.mxu0 %v812_v4  ;;  %875 = vmatpush1.bf16.msra.mxu1 %v812_v4  ;;  %v818_v9 = vpack.c.bf16 %v118_v8, %v117_v7  ;;  %v50_v12 = vld [vmem:[#allocation3 + $0x8] sm:$0xff]  ;;  %v821_v13 = vpack.c.bf16 %v120_v11, %v119_v10  ;;  %v121_v15 = vld [vmem:[#allocation5 + $0x40] sm:$0xff]  ;;  %v123_v18 = vld [vmem:[#allocation5 + $0x50] sm:$0xff] }
  0x2a   :  { %814 = vmatprep.subr.bf16.mxu0 %v1080_v0  ;;  %860 = vmatprep.subr.bf16.mxu1 %v1080_v0  ;;  %v82_v14 = vld [vmem:[#allocation3 + $0x108] sm:$0xff]  ;;  %v124_v19 = vld [vmem:[#allocation5 + $0x58] sm:$0xff]  ;;  %v125_v21 = vld [vmem:[#allocation5 + $0x60] sm:$0xff] }
  0x2b   :  { %v122_v16 = vld [vmem:[#allocation5 + $0x48] sm:$0xff]  ;;  %216 = vmatprep.mubr.f32.mxu0 %v50_v12  ;;  %296 = vmatprep.mubr.f32.mxu1 %v82_v14  ;;  %v827_v20 = vpack.c.bf16 %v124_v19, %v123_v18  ;;  %v127_v24 = vld [vmem:[#allocation5 + $0x70] sm:$0xff]  ;;  %v128_v25 = vld [vmem:[#allocation5 + $0x78] sm:$0xff] }
  0x2c   :  { %v824_v17 = vpack.c.bf16 %v122_v16, %v121_v15  ;;  %v126_v22 = vld [vmem:[#allocation5 + $0x68] sm:$0xff]  ;;  %v833_v26 = vpack.c.bf16 %v128_v25, %v127_v24  ;;  %v129_v27 = vld [vmem:[#allocation5 + $0x80] sm:$0xff]  ;;  %v131_v30 = vld [vmem:[#allocation5 + $0x90] sm:$0xff] }
  0x2d   :  { %816 = vmatpush1.bf16.msra.mxu0 %v815_v6  ;;  %876 = vmatpush1.bf16.msra.mxu1 %v815_v6  ;;  %v830_v23 = vpack.c.bf16 %v126_v22, %v125_v21  ;;  %v130_v28 = vld [vmem:[#allocation5 + $0x88] sm:$0xff]  ;;  %v132_v31 = vld [vmem:[#allocation5 + $0x98] sm:$0xff]  ;;  %v133_v33 = vld [vmem:[#allocation5 + $0xa0] sm:$0xff] }
  0x2e   :  { %817 = vmatprep.subr.bf16.mxu0 %v1080_v0  ;;  %861 = vmatprep.subr.bf16.mxu1 %v1080_v0  ;;  %v836_v29 = vpack.c.bf16 %v130_v28, %v129_v27  ;;  %v839_v32 = vpack.c.bf16 %v132_v31, %v131_v30  ;;  %v134_v34 = vld [vmem:[#allocation5 + $0xa8] sm:$0xff]  ;;  %v135_v36 = vld [vmem:[#allocation5 + $0xb0] sm:$0xff]  ;;  %v136_v37 = vld [vmem:[#allocation5 + $0xb8] sm:$0xff] }
  0x2f   :  { %v842_v35 = vpack.c.bf16 %v134_v34, %v133_v33  ;;  %v845_v38 = vpack.c.bf16 %v136_v37, %v135_v36  ;;  %v137_v39 = vld [vmem:[#allocation5 + $0xc0] sm:$0xff]  ;;  %v138_v40 = vld [vmem:[#allocation5 + $0xc8] sm:$0xff]  ;;  %v139_v42 = vld [vmem:[#allocation5 + $0xd0] sm:$0xff] }
  0x30   :  { %v848_v41 = vpack.c.bf16 %v138_v40, %v137_v39  ;;  %v140_v43 = vld [vmem:[#allocation5 + $0xd8] sm:$0xff]  ;;  %v141_v45 = vld [vmem:[#allocation5 + $0xe0] sm:$0xff]  ;;  %v142_v46 = vld [vmem:[#allocation5 + $0xe8] sm:$0xff] }
  0x31   :  { %819 = vmatpush1.bf16.msra.mxu0 %v818_v9  ;;  %877 = vmatpush1.bf16.msra.mxu1 %v818_v9  ;;  %v851_v44 = vpack.c.bf16 %v140_v43, %v139_v42  ;;  %v854_v47 = vpack.c.bf16 %v142_v46, %v141_v45  ;;  %v143_v48 = vld [vmem:[#allocation5 + $0xf0] sm:$0xff]  ;;  %v144_v49 = vld [vmem:[#allocation5 + $0xf8] sm:$0xff]  ;;  %v49_v51 = vld [vmem:[#allocation3] sm:$0xff] }
  0x32   :  { %820 = vmatprep.subr.bf16.mxu0 %v1080_v0  ;;  %862 = vmatprep.subr.bf16.mxu1 %v1080_v0  ;;  %v857_v50 = vpack.c.bf16 %v144_v49, %v143_v48  ;;  %v81_v52 = vld [vmem:[#allocation3 + $0x100] sm:$0xff]  ;;  %v52_v53 = vld [vmem:[#allocation3 + $0x18] sm:$0xff]  ;;  %v51_v55 = vld [vmem:[#allocation3 + $0x10] sm:$0xff] }
  0x33   :  { %v84_v54 = vld [vmem:[#allocation3 + $0x118] sm:$0xff]  ;;  %v83_v56 = vld [vmem:[#allocation3 + $0x110] sm:$0xff]  ;;  %v54_v57 = vld [vmem:[#allocation3 + $0x28] sm:$0xff] }
  0x34   :  { %v86_v58 = vld [vmem:[#allocation3 + $0x128] sm:$0xff]  ;;  %v53_v59 = vld [vmem:[#allocation3 + $0x20] sm:$0xff]  ;;  %v56_v61 = vld [vmem:[#allocation3 + $0x38] sm:$0xff] }
  0x35   :  { %822 = vmatpush1.bf16.msra.mxu0 %v821_v13  ;;  %878 = vmatpush1.bf16.msra.mxu1 %v821_v13  ;;  %v85_v60 = vld [vmem:[#allocation3 + $0x120] sm:$0xff]  ;;  %v88_v62 = vld [vmem:[#allocation3 + $0x138] sm:$0xff]  ;;  %v55_v63 = vld [vmem:[#allocation3 + $0x30] sm:$0xff] }
  0x36   :  { %823 = vmatprep.subr.bf16.mxu0 %v1080_v0  ;;  %863 = vmatprep.subr.bf16.mxu1 %v1080_v0  ;;  %v58_v1 = vld [vmem:[#allocation3 + $0x48] sm:$0xff]  ;;  %v57_v3 = vld [vmem:[#allocation3 + $0x40] sm:$0xff]  ;;  %v60_v5 = vld [vmem:[#allocation3 + $0x58] sm:$0xff] }
  0x37   :  { %v90_v2 = vld [vmem:[#allocation3 + $0x148] sm:$0xff]  ;;  %v89_v4 = vld [vmem:[#allocation3 + $0x140] sm:$0xff]  ;;  %v92_v6 = vld [vmem:[#allocation3 + $0x158] sm:$0xff] }
  0x38   :  { %v59_v7 = vld [vmem:[#allocation3 + $0x50] sm:$0xff]  ;;  %v62_v9 = vld [vmem:[#allocation3 + $0x68] sm:$0xff]  ;;  %v61_v11 = vld [vmem:[#allocation3 + $0x60] sm:$0xff] }
  0x39   :  { %825 = vmatpush1.bf16.msra.mxu0 %v824_v17  ;;  %879 = vmatpush1.bf16.msra.mxu1 %v824_v17  ;;  %v91_v8 = vld [vmem:[#allocation3 + $0x150] sm:$0xff]  ;;  %v94_v10 = vld [vmem:[#allocation3 + $0x168] sm:$0xff]  ;;  %v93_v12 = vld [vmem:[#allocation3 + $0x160] sm:$0xff] }
  0x3a   :  { %826 = vmatprep.subr.bf16.mxu0 %v1080_v0  ;;  %864 = vmatprep.subr.bf16.mxu1 %v1080_v0  ;;  %v64_v13 = vld [vmem:[#allocation3 + $0x78] sm:$0xff]  ;;  %v63_v15 = vld [vmem:[#allocation3 + $0x70] sm:$0xff]  ;;  %v66_v17 = vld [vmem:[#allocation3 + $0x88] sm:$0xff] }
  0x3b   :  { %v96_v14 = vld [vmem:[#allocation3 + $0x178] sm:$0xff]  ;;  %v95_v16 = vld [vmem:[#allocation3 + $0x170] sm:$0xff]  ;;  %v98_v18 = vld [vmem:[#allocation3 + $0x188] sm:$0xff] }
  0x3c   :  { %v65_v19 = vld [vmem:[#allocation3 + $0x80] sm:$0xff]  ;;  %v68_v21 = vld [vmem:[#allocation3 + $0x98] sm:$0xff]  ;;  %v99_v24 = vld [vmem:[#allocation3 + $0x190] sm:$0xff] }
  0x3d   :  { %828 = vmatpush1.bf16.msra.mxu0 %v827_v20  ;;  %880 = vmatpush1.bf16.msra.mxu1 %v827_v20  ;;  %v97_v20 = vld [vmem:[#allocation3 + $0x180] sm:$0xff]  ;;  %v100_v22 = vld [vmem:[#allocation3 + $0x198] sm:$0xff]  ;;  %v70_v25 = vld [vmem:[#allocation3 + $0xa8] sm:$0xff] }
  0x3e   :  { %829 = vmatprep.subr.bf16.mxu0 %v1080_v0  ;;  %865 = vmatprep.subr.bf16.mxu1 %v1080_v0  ;;  %v69_v27 = vld [vmem:[#allocation3 + $0xa0] sm:$0xff]  ;;  %v104_v30 = vld [vmem:[#allocation3 + $0x1b8] sm:$0xff]  ;;  %v71_v31 = vld [vmem:[#allocation3 + $0xb0] sm:$0xff] }
  0x3f   :  { %v101_v28 = vld [vmem:[#allocation3 + $0x1a0] sm:$0xff]  ;;  %v74_v33 = vld [vmem:[#allocation3 + $0xc8] sm:$0xff]  ;;  %v76_v37 = vld [vmem:[#allocation3 + $0xd8] sm:$0xff] }
  0x40   :  { %v106_v34 = vld [vmem:[#allocation3 + $0x1c8] sm:$0xff]  ;;  %v105_v36 = vld [vmem:[#allocation3 + $0x1c0] sm:$0xff]  ;;  %v75_v39 = vld [vmem:[#allocation3 + $0xd0] sm:$0xff] }
  0x41   :  { %831 = vmatpush1.bf16.msra.mxu0 %v830_v23  ;;  %881 = vmatpush1.bf16.msra.mxu1 %v830_v23  ;;  %v67_v23 = vld [vmem:[#allocation3 + $0x90] sm:$0xff]  ;;  %v110_v42 = vld [vmem:[#allocation3 + $0x1e8] sm:$0xff]  ;;  %v77_v43 = vld [vmem:[#allocation3 + $0xe0] sm:$0xff] }
  0x42   :  { %832 = vmatprep.subr.bf16.mxu0 %v1080_v0  ;;  %866 = vmatprep.subr.bf16.mxu1 %v1080_v0  ;;  %v107_v40 = vld [vmem:[#allocation3 + $0x1d0] sm:$0xff]  ;;  %v80_v45 = vld [vmem:[#allocation3 + $0xf8] sm:$0xff]  ;;  %v1170_v49 = vld [vmem:[%s1408_s2] ss:$0 sm:$0xff] }
  0x43   :  { %v112_v46 = vld [vmem:[#allocation3 + $0x1f8] sm:$0xff]  ;;  %v111_v48 = vld [vmem:[#allocation3 + $0x1f0] sm:$0xff] }
  0x45   :  { %834 = vmatpush1.bf16.msra.mxu0 %v833_v26  ;;  %882 = vmatpush1.bf16.msra.mxu1 %v833_v26  ;;  %v102_v26 = vld [vmem:[#allocation3 + $0x1a8] sm:$0xff] }
  0x46   :  { %835 = vmatprep.subr.bf16.mxu0 %v1080_v0  ;;  %867 = vmatprep.subr.bf16.mxu1 %v1080_v0 }
  0x49   :  { %837 = vmatpush1.bf16.msra.mxu0 %v836_v29  ;;  %883 = vmatpush1.bf16.msra.mxu1 %v836_v29  ;;  %v72_v29 = vld [vmem:[#allocation3 + $0xb8] sm:$0xff] }
  0x4a   :  { %838 = vmatprep.subr.bf16.mxu0 %v1080_v0  ;;  %868 = vmatprep.subr.bf16.mxu1 %v1080_v0 }
  0x4d   :  { %840 = vmatpush1.bf16.msra.mxu0 %v839_v32  ;;  %884 = vmatpush1.bf16.msra.mxu1 %v839_v32  ;;  %v103_v32 = vld [vmem:[#allocation3 + $0x1b0] sm:$0xff] }
  0x4e   :  { %841 = vmatprep.subr.bf16.mxu0 %v1080_v0  ;;  %869 = vmatprep.subr.bf16.mxu1 %v1080_v0 }
  0x51   :  { %843 = vmatpush1.bf16.msra.mxu0 %v842_v35  ;;  %885 = vmatpush1.bf16.msra.mxu1 %v842_v35  ;;  %v73_v35 = vld [vmem:[#allocation3 + $0xc0] sm:$0xff] }
  0x52   :  { %844 = vmatprep.subr.bf16.mxu0 %v1080_v0  ;;  %870 = vmatprep.subr.bf16.mxu1 %v1080_v0 }
  0x55   :  { %846 = vmatpush1.bf16.msra.mxu0 %v845_v38  ;;  %886 = vmatpush1.bf16.msra.mxu1 %v845_v38  ;;  %v108_v38 = vld [vmem:[#allocation3 + $0x1d8] sm:$0xff] }
  0x56   :  { %847 = vmatprep.subr.bf16.mxu0 %v1080_v0  ;;  %871 = vmatprep.subr.bf16.mxu1 %v1080_v0 }
  0x59   :  { %849 = vmatpush1.bf16.msra.mxu0 %v848_v41  ;;  %887 = vmatpush1.bf16.msra.mxu1 %v848_v41  ;;  %v78_v41 = vld [vmem:[#allocation3 + $0xe8] sm:$0xff] }
  0x5a   :  { %850 = vmatprep.subr.bf16.mxu0 %v1080_v0  ;;  %872 = vmatprep.subr.bf16.mxu1 %v1080_v0 }
  0x5d   :  { %852 = vmatpush1.bf16.msra.mxu0 %v851_v44  ;;  %888 = vmatpush1.bf16.msra.mxu1 %v851_v44  ;;  %v109_v44 = vld [vmem:[#allocation3 + $0x1e0] sm:$0xff] }
  0x5e   :  { %853 = vmatprep.subr.bf16.mxu0 %v1080_v0  ;;  %873 = vmatprep.subr.bf16.mxu1 %v1080_v0 }
  0x61   :  { %855 = vmatpush1.bf16.msra.mxu0 %v854_v47  ;;  %889 = vmatpush1.bf16.msra.mxu1 %v854_v47  ;;  %v79_v47 = vld [vmem:[#allocation3 + $0xf0] sm:$0xff] }
  0x62   :  { %856 = vmatprep.subr.bf16.mxu0 %v1080_v0  ;;  %874 = vmatprep.subr.bf16.mxu1 %v1080_v0  ;;  %v87_v0 = vld [vmem:[#allocation3 + $0x130] sm:$0xff] }
  0x65   :  { %858 = vmatpush1.bf16.msra.mxu0 %v857_v50  ;;  %890 = vmatpush1.bf16.msra.mxu1 %v857_v50 }
  0x68   :  { %217 = vmatmul.mubr.f32.vlgmr.msra.gmra.mrb[0].mxu0 %v49_v51  ;;  %297 = vmatmul.mubr.f32.vlgmr.msra.gmra.mrb[0].mxu1 %v81_v52 }
  0x69   :  { %221 = vmatprep.mubr.f32.mxu0 %v52_v53  ;;  %301 = vmatprep.mubr.f32.mxu1 %v84_v54 }
  0x6c   :  { %222 = vmatmul.mubr.f32.gmra.mrb[2].mxu0 %v51_v55  ;;  %302 = vmatmul.mubr.f32.gmra.mrb[2].mxu1 %v83_v56  ;;  %v1177_v56 = vld [vmem:[%s1409_s3] ss:$0 sm:$0xff] }
  0x6d   :  { %226 = vmatprep.mubr.f32.mxu0 %v54_v57  ;;  %306 = vmatprep.mubr.f32.mxu1 %v86_v58 }
  0x70   :  { %227 = vmatmul.mubr.f32.gmra.mrb[4].mxu0 %v53_v59  ;;  %307 = vmatmul.mubr.f32.gmra.mrb[4].mxu1 %v85_v60 }
  0x71   :  { %231 = vmatprep.mubr.f32.mxu0 %v56_v61  ;;  %311 = vmatprep.mubr.f32.mxu1 %v88_v62 }
  0x74   :  { %232 = vmatmul.mubr.f32.gmra.mrb[6].mxu0 %v55_v63  ;;  %312 = vmatmul.mubr.f32.gmra.mrb[6].mxu1 %v87_v0 }
  0x75   :  { %236 = vmatprep.mubr.f32.mxu0 %v58_v1  ;;  %316 = vmatprep.mubr.f32.mxu1 %v90_v2 }
  0x78   :  { %237 = vmatmul.mubr.f32.gmra.mrb[8].mxu0 %v57_v3  ;;  %317 = vmatmul.mubr.f32.gmra.mrb[8].mxu1 %v89_v4 }
  0x79   :  { %241 = vmatprep.mubr.f32.mxu0 %v60_v5  ;;  %321 = vmatprep.mubr.f32.mxu1 %v92_v6 }
  0x7c   :  { %242 = vmatmul.mubr.f32.gmra.mrb[10].mxu0 %v59_v7  ;;  %322 = vmatmul.mubr.f32.gmra.mrb[10].mxu1 %v91_v8 }
  0x7d   :  { %246 = vmatprep.mubr.f32.mxu0 %v62_v9  ;;  %326 = vmatprep.mubr.f32.mxu1 %v94_v10 }
  0x80   :  { %247 = vmatmul.mubr.f32.gmra.mrb[12].mxu0 %v61_v11  ;;  %327 = vmatmul.mubr.f32.gmra.mrb[12].mxu1 %v93_v12 }
  0x81   :  { %251 = vmatprep.mubr.f32.mxu0 %v64_v13  ;;  %331 = vmatprep.mubr.f32.mxu1 %v96_v14 }
  0x84   :  { %252 = vmatmul.mubr.f32.gmra.mrb[14].mxu0 %v63_v15  ;;  %332 = vmatmul.mubr.f32.gmra.mrb[14].mxu1 %v95_v16 }
  0x85   :  { %256 = vmatprep.mubr.f32.mxu0 %v66_v17  ;;  %336 = vmatprep.mubr.f32.mxu1 %v98_v18 }
  0x88   :  { %257 = vmatmul.mubr.f32.gmra.mrb[16].mxu0 %v65_v19  ;;  %337 = vmatmul.mubr.f32.gmra.mrb[16].mxu1 %v97_v20 }
  0x89   :  { %261 = vmatprep.mubr.f32.mxu0 %v68_v21  ;;  %341 = vmatprep.mubr.f32.mxu1 %v100_v22 }
  0x8c   :  { %262 = vmatmul.mubr.f32.gmra.mrb[18].mxu0 %v67_v23  ;;  %342 = vmatmul.mubr.f32.gmra.mrb[18].mxu1 %v99_v24 }
  0x8d   :  { %266 = vmatprep.mubr.f32.mxu0 %v70_v25  ;;  %346 = vmatprep.mubr.f32.mxu1 %v102_v26 }
  0x90   :  { %267 = vmatmul.mubr.f32.gmra.mrb[20].mxu0 %v69_v27  ;;  %347 = vmatmul.mubr.f32.gmra.mrb[20].mxu1 %v101_v28 }
  0x91   :  { %271 = vmatprep.mubr.f32.mxu0 %v72_v29  ;;  %351 = vmatprep.mubr.f32.mxu1 %v104_v30 }
  0x94   :  { %272 = vmatmul.mubr.f32.gmra.mrb[22].mxu0 %v71_v31  ;;  %352 = vmatmul.mubr.f32.gmra.mrb[22].mxu1 %v103_v32 }
  0x95   :  { %276 = vmatprep.mubr.f32.mxu0 %v74_v33  ;;  %356 = vmatprep.mubr.f32.mxu1 %v106_v34 }
  0x98   :  { %277 = vmatmul.mubr.f32.gmra.mrb[24].mxu0 %v73_v35  ;;  %357 = vmatmul.mubr.f32.gmra.mrb[24].mxu1 %v105_v36 }
  0x99   :  { %281 = vmatprep.mubr.f32.mxu0 %v76_v37  ;;  %361 = vmatprep.mubr.f32.mxu1 %v108_v38 }
  0x9c   :  { %282 = vmatmul.mubr.f32.gmra.mrb[26].mxu0 %v75_v39  ;;  %362 = vmatmul.mubr.f32.gmra.mrb[26].mxu1 %v107_v40 }
  0x9d   :  { %286 = vmatprep.mubr.f32.mxu0 %v78_v41  ;;  %366 = vmatprep.mubr.f32.mxu1 %v110_v42 }
  0xa0   :  { %287 = vmatmul.mubr.f32.gmra.mrb[28].mxu0 %v77_v43  ;;  %367 = vmatmul.mubr.f32.gmra.mrb[28].mxu1 %v109_v44 }
  0xa1   :  { %291 = vmatprep.mubr.f32.mxu0 %v80_v45  ;;  %371 = vmatprep.mubr.f32.mxu1 %v112_v46 }
  0xa4   :  { %292 = vmatmul.mubr.f32.gmra.mrb[30].mxu0 %v79_v47  ;;  %372 = vmatmul.mubr.f32.gmra.mrb[30].mxu1 %v111_v48 }
 0x13b   :  { %v218_v50 = vpop.f32.mrb[0].mxu0  ;;  %v298_v51 = vpop.f32.mrb[0].mxu1 }
 0x13c   :  { %v219_v52 = vadd.f32 %v1170_v49, %v218_v50  ;;  %v299_v53 = vadd.f32 %v1170_v49, %v298_v51  ;;  %v220_v54 = vpop.f32.mrb[1].mxu0  ;;  %v300_v55 = vpop.f32.mrb[1].mxu1 }
 0x13e   :  { %v409_v57 = vmul.f32 0.1, %v219_v52  ;;  %v425_v58 = vmul.f32 0.1, %v299_v53  ;;  %vm377_vm0 = vcmp.gt.f32.partialorder %v219_v52, 0.0  ;;  %vm393_vm1 = vcmp.gt.f32.partialorder %v299_v53, 0.0 }
 0x13f   :  { %v223_v59 = vpop.f32.mrb[2].mxu0  ;;  %v303_v60 = vpop.f32.mrb[2].mxu1 }
 0x140   :  { %v224_v61 = vadd.f32 %v1170_v49, %v223_v59  ;;  %v304_v62 = vadd.f32 %v1170_v49, %v303_v60  ;;  %v225_v63 = vpop.f32.mrb[3].mxu0  ;;  %v305_v0 = vpop.f32.mrb[3].mxu1  ;;  %v441_v1 = vsel %vm377_vm0, %v219_v52, %v409_v57  ;;  %v457_v3 = vsel %vm393_vm1, %v299_v53, %v425_v58 }
 0x141   :  { %v480_v2 = vmul.f32 %v1177_v56, %v441_v1  ;;  %v496_v14 = vmul.f32 %v1177_v56, %v457_v3 }
 0x142   :  { %v410_v4 = vmul.f32 0.1, %v224_v61  ;;  %v426_v5 = vmul.f32 0.1, %v304_v62  ;;  %vm394_vm2 = vcmp.gt.f32.partialorder %v304_v62, 0.0  ;;  %vm378_vm3 = vcmp.gt.f32.partialorder %v224_v61, 0.0 }
 0x143   :  { %v228_v6 = vpop.f32.mrb[4].mxu0  ;;  %512 = vadd.xlane.f32.xlu0 %v480_v2  ;;  %v308_v7 = vpop.f32.mrb[4].mxu1 }
 0x144   :  { %v229_v8 = vadd.f32 %v1170_v49, %v228_v6  ;;  %v230_v9 = vpop.f32.mrb[5].mxu0  ;;  %v309_v10 = vadd.f32 %v1170_v49, %v308_v7  ;;  %v310_v11 = vpop.f32.mrb[5].mxu1  ;;  %v458_v12 = vsel %vm394_vm2, %v304_v62, %v426_v5  ;;  %v442_v15 = vsel %vm378_vm3, %v224_v61, %v410_v4 }
 0x145   :  { %v497_v13 = vmul.f32 %v1177_v56, %v458_v12  ;;  %v481_v26 = vmul.f32 %v1177_v56, %v442_v15 }
 0x146   :  { %v411_v16 = vmul.f32 0.1, %v229_v8  ;;  %v427_v17 = vmul.f32 0.1, %v309_v10  ;;  %vm379_vm4 = vcmp.gt.f32.partialorder %v229_v8, 0.0  ;;  %vm395_vm5 = vcmp.gt.f32.partialorder %v309_v10, 0.0 }
 0x147   :  { %546 = vadd.xlane.f32.xlu1 %v497_v13  ;;  %v233_v18 = vpop.f32.mrb[6].mxu0  ;;  %544 = vadd.xlane.f32.xlu0 %v496_v14  ;;  %v313_v19 = vpop.f32.mrb[6].mxu1 }
 0x148   :  { %v234_v20 = vadd.f32 %v1170_v49, %v233_v18  ;;  %v235_v21 = vpop.f32.mrb[7].mxu0  ;;  %v314_v22 = vadd.f32 %v1170_v49, %v313_v19  ;;  %v315_v23 = vpop.f32.mrb[7].mxu1  ;;  %v443_v24 = vsel %vm379_vm4, %v229_v8, %v411_v16  ;;  %v459_v27 = vsel %vm395_vm5, %v309_v10, %v427_v17 }
 0x149   :  { %v482_v25 = vmul.f32 %v1177_v56, %v443_v24  ;;  %v498_v38 = vmul.f32 %v1177_v56, %v459_v27 }
 0x14a   :  { %v412_v28 = vmul.f32 0.1, %v234_v20  ;;  %v428_v29 = vmul.f32 0.1, %v314_v22  ;;  %vm380_vm6 = vcmp.gt.f32.partialorder %v234_v20, 0.0  ;;  %vm396_vm7 = vcmp.gt.f32.partialorder %v314_v22, 0.0 }
 0x14b   :  { %v238_v30 = vpop.f32.mrb[8].mxu0  ;;  %516 = vadd.xlane.f32.xlu1 %v482_v25  ;;  %514 = vadd.xlane.f32.xlu0 %v481_v26  ;;  %v318_v31 = vpop.f32.mrb[8].mxu1 }
 0x14c   :  { %v239_v32 = vadd.f32 %v1170_v49, %v238_v30  ;;  %v240_v33 = vpop.f32.mrb[9].mxu0  ;;  %v319_v34 = vadd.f32 %v1170_v49, %v318_v31  ;;  %v320_v35 = vpop.f32.mrb[9].mxu1  ;;  %v444_v36 = vsel %vm380_vm6, %v234_v20, %v412_v28  ;;  %v460_v39 = vsel %vm396_vm7, %v314_v22, %v428_v29 }
 0x14d   :  { %v483_v37 = vmul.f32 %v1177_v56, %v444_v36  ;;  %v499_v50 = vmul.f32 %v1177_v56, %v460_v39 }
 0x14e   :  { %v413_v40 = vmul.f32 0.1, %v239_v32  ;;  %v429_v41 = vmul.f32 0.1, %v319_v34  ;;  %vm381_vm8 = vcmp.gt.f32.partialorder %v239_v32, 0.0  ;;  %vm397_vm9 = vcmp.gt.f32.partialorder %v319_v34, 0.0 }
 0x14f   :  { %v243_v42 = vpop.f32.mrb[10].mxu0  ;;  %518 = vadd.xlane.f32.xlu1 %v483_v37  ;;  %548 = vadd.xlane.f32.xlu0 %v498_v38  ;;  %v323_v43 = vpop.f32.mrb[10].mxu1 }
 0x150   :  { %v244_v44 = vadd.f32 %v1170_v49, %v243_v42  ;;  %v245_v45 = vpop.f32.mrb[11].mxu0  ;;  %v324_v46 = vadd.f32 %v1170_v49, %v323_v43  ;;  %v325_v47 = vpop.f32.mrb[11].mxu1  ;;  %v445_v48 = vsel %vm381_vm8, %v239_v32, %v413_v40  ;;  %v461_v52 = vsel %vm397_vm9, %v319_v34, %v429_v41 }
 0x151   :  { %v484_v51 = vmul.f32 %v1177_v56, %v445_v48  ;;  %v500_v0 = vmul.f32 %v1177_v56, %v461_v52 }
 0x152   :  { %v414_v53 = vmul.f32 0.1, %v244_v44  ;;  %v430_v54 = vmul.f32 0.1, %v324_v46  ;;  %vm382_vm10 = vcmp.gt.f32.partialorder %v244_v44, 0.0  ;;  %vm398_vm11 = vcmp.gt.f32.partialorder %v324_v46, 0.0 }
 0x153   :  { %v248_v55 = vpop.f32.mrb[12].mxu0  ;;  %550 = vadd.xlane.f32.xlu1 %v499_v50  ;;  %520 = vadd.xlane.f32.xlu0 %v484_v51  ;;  %v328_v57 = vpop.f32.mrb[12].mxu1 }
 0x154   :  { %v249_v58 = vadd.f32 %v1170_v49, %v248_v55  ;;  %v250_v59 = vpop.f32.mrb[13].mxu0  ;;  %v329_v60 = vadd.f32 %v1170_v49, %v328_v57  ;;  %v330_v61 = vpop.f32.mrb[13].mxu1  ;;  %v446_v62 = vsel %vm382_vm10, %v244_v44, %v414_v53  ;;  %v462_v1 = vsel %vm398_vm11, %v324_v46, %v430_v54 }
 0x155   :  { %v485_v63 = vmul.f32 %v1177_v56, %v446_v62  ;;  %v501_v11 = vmul.f32 %v1177_v56, %v462_v1 }
 0x156   :  { %v415_v2 = vmul.f32 0.1, %v249_v58  ;;  %v431_v3 = vmul.f32 0.1, %v329_v60  ;;  %vm383_vm12 = vcmp.gt.f32.partialorder %v249_v58, 0.0  ;;  %vm399_vm13 = vcmp.gt.f32.partialorder %v329_v60, 0.0 }
 0x157   :  { %v253_v4 = vpop.f32.mrb[14].mxu0  ;;  %522 = vadd.xlane.f32.xlu1 %v485_v63  ;;  %552 = vadd.xlane.f32.xlu0 %v500_v0  ;;  %v333_v5 = vpop.f32.mrb[14].mxu1 }
 0x158   :  { %v254_v6 = vadd.f32 %v1170_v49, %v253_v4  ;;  %v255_v7 = vpop.f32.mrb[15].mxu0  ;;  %v334_v8 = vadd.f32 %v1170_v49, %v333_v5  ;;  %v335_v9 = vpop.f32.mrb[15].mxu1  ;;  %v447_v10 = vsel %vm383_vm12, %v249_v58, %v415_v2  ;;  %v463_v13 = vsel %vm399_vm13, %v329_v60, %v431_v3 }
 0x159   :  { %v486_v12 = vmul.f32 %v1177_v56, %v447_v10  ;;  %v502_v24 = vmul.f32 %v1177_v56, %v463_v13 }
 0x15a   :  { %v416_v14 = vmul.f32 0.1, %v254_v6  ;;  %v432_v15 = vmul.f32 0.1, %v334_v8  ;;  %vm384_vm14 = vcmp.gt.f32.partialorder %v254_v6, 0.0  ;;  %vm400_vm15 = vcmp.gt.f32.partialorder %v334_v8, 0.0 }
 0x15b   :  { %v258_v16 = vpop.f32.mrb[16].mxu0  ;;  %554 = vadd.xlane.f32.xlu1 %v501_v11  ;;  %524 = vadd.xlane.f32.xlu0 %v486_v12  ;;  %v338_v17 = vpop.f32.mrb[16].mxu1 }
 0x15c   :  { %v259_v18 = vadd.f32 %v1170_v49, %v258_v16  ;;  %v260_v19 = vpop.f32.mrb[17].mxu0  ;;  %v339_v20 = vadd.f32 %v1170_v49, %v338_v17  ;;  %v340_v21 = vpop.f32.mrb[17].mxu1  ;;  %v448_v22 = vsel %vm384_vm14, %v254_v6, %v416_v14  ;;  %v464_v25 = vsel %vm400_vm15, %v334_v8, %v432_v15 }
 0x15d   :  { %v487_v23 = vmul.f32 %v1177_v56, %v448_v22  ;;  %v503_v35 = vmul.f32 %v1177_v56, %v464_v25 }
 0x15e   :  { %v417_v26 = vmul.f32 0.1, %v259_v18  ;;  %v433_v27 = vmul.f32 0.1, %v339_v20  ;;  %vm385_vm0 = vcmp.gt.f32.partialorder %v259_v18, 0.0  ;;  %vm401_vm1 = vcmp.gt.f32.partialorder %v339_v20, 0.0 }
 0x15f   :  { %v263_v28 = vpop.f32.mrb[18].mxu0  ;;  %526 = vadd.xlane.f32.xlu1 %v487_v23  ;;  %556 = vadd.xlane.f32.xlu0 %v502_v24  ;;  %v343_v29 = vpop.f32.mrb[18].mxu1 }
 0x160   :  { %v264_v30 = vadd.f32 %v1170_v49, %v263_v28  ;;  %v265_v31 = vpop.f32.mrb[19].mxu0  ;;  %v344_v32 = vadd.f32 %v1170_v49, %v343_v29  ;;  %v345_v33 = vpop.f32.mrb[19].mxu1  ;;  %v449_v34 = vsel %vm385_vm0, %v259_v18, %v417_v26  ;;  %v465_v37 = vsel %vm401_vm1, %v339_v20, %v433_v27 }
 0x161   :  { %v488_v36 = vmul.f32 %v1177_v56, %v449_v34  ;;  %v504_v48 = vmul.f32 %v1177_v56, %v465_v37  ;;  %vm770_vm0 = vcmask 7168  }
 0x162   :  { %v418_v38 = vmul.f32 0.1, %v264_v30  ;;  %v434_v39 = vmul.f32 0.1, %v344_v32  ;;  %vm386_vm2 = vcmp.gt.f32.partialorder %v264_v30, 0.0  ;;  %vm402_vm3 = vcmp.gt.f32.partialorder %v344_v32, 0.0 }
 0x163   :  { %v268_v40 = vpop.f32.mrb[20].mxu0  ;;  %558 = vadd.xlane.f32.xlu1 %v503_v35  ;;  %528 = vadd.xlane.f32.xlu0 %v488_v36  ;;  %v348_v41 = vpop.f32.mrb[20].mxu1 }
 0x164   :  { %v269_v42 = vadd.f32 %v1170_v49, %v268_v40  ;;  %v270_v43 = vpop.f32.mrb[21].mxu0  ;;  %v349_v44 = vadd.f32 %v1170_v49, %v348_v41  ;;  %v350_v45 = vpop.f32.mrb[21].mxu1  ;;  %v450_v46 = vsel %vm386_vm2, %v264_v30, %v418_v38  ;;  %v466_v50 = vsel %vm402_vm3, %v344_v32, %v434_v39 }
 0x165   :  { %v489_v47 = vmul.f32 %v1177_v56, %v450_v46  ;;  %v505_v61 = vmul.f32 %v1177_v56, %v466_v50 }
 0x166   :  { %v419_v51 = vmul.f32 0.1, %v269_v42  ;;  %v435_v52 = vmul.f32 0.1, %v349_v44  ;;  %vm387_vm4 = vcmp.gt.f32.partialorder %v269_v42, 0.0  ;;  %vm403_vm5 = vcmp.gt.f32.partialorder %v349_v44, 0.0 }
 0x167   :  { %v273_v53 = vpop.f32.mrb[22].mxu0  ;;  %530 = vadd.xlane.f32.xlu1 %v489_v47  ;;  %560 = vadd.xlane.f32.xlu0 %v504_v48  ;;  %v353_v54 = vpop.f32.mrb[22].mxu1 }
 0x168   :  { %v274_v55 = vadd.f32 %v1170_v49, %v273_v53  ;;  %v275_v57 = vpop.f32.mrb[23].mxu0  ;;  %v354_v58 = vadd.f32 %v1170_v49, %v353_v54  ;;  %v355_v59 = vpop.f32.mrb[23].mxu1  ;;  %v451_v60 = vsel %vm387_vm4, %v269_v42, %v419_v51  ;;  %v467_v63 = vsel %vm403_vm5, %v349_v44, %v435_v52 }
 0x169   :  { %v490_v62 = vmul.f32 %v1177_v56, %v451_v60  ;;  %v506_v10 = vmul.f32 %v1177_v56, %v467_v63 }
 0x16a   :  { %v420_v0 = vmul.f32 0.1, %v274_v55  ;;  %v436_v1 = vmul.f32 0.1, %v354_v58  ;;  %vm388_vm6 = vcmp.gt.f32.partialorder %v274_v55, 0.0  ;;  %vm404_vm7 = vcmp.gt.f32.partialorder %v354_v58, 0.0 }
 0x16b   :  { %v278_v2 = vpop.f32.mrb[24].mxu0  ;;  %562 = vadd.xlane.f32.xlu1 %v505_v61  ;;  %532 = vadd.xlane.f32.xlu0 %v490_v62  ;;  %v358_v3 = vpop.f32.mrb[24].mxu1 }
 0x16c   :  { %v279_v4 = vadd.f32 %v1170_v49, %v278_v2  ;;  %v280_v5 = vpop.f32.mrb[25].mxu0  ;;  %v359_v6 = vadd.f32 %v1170_v49, %v358_v3  ;;  %v360_v7 = vpop.f32.mrb[25].mxu1  ;;  %v452_v8 = vsel %vm388_vm6, %v274_v55, %v420_v0  ;;  %v468_v11 = vsel %vm404_vm7, %v354_v58, %v436_v1 }
 0x16d   :  { %v491_v9 = vmul.f32 %v1177_v56, %v452_v8  ;;  %v507_v21 = vmul.f32 %v1177_v56, %v468_v11  ;;  %v1244_v55 = vstv %s1410_s4 }
 0x16e   :  { %v421_v12 = vmul.f32 0.1, %v279_v4  ;;  %v437_v13 = vmul.f32 0.1, %v359_v6  ;;  %vm389_vm8 = vcmp.gt.f32.partialorder %v279_v4, 0.0  ;;  %vm405_vm9 = vcmp.gt.f32.partialorder %v359_v6, 0.0 }
 0x16f   :  { %v283_v14 = vpop.f32.mrb[26].mxu0  ;;  %534 = vadd.xlane.f32.xlu1 %v491_v9  ;;  %564 = vadd.xlane.f32.xlu0 %v506_v10  ;;  %v363_v15 = vpop.f32.mrb[26].mxu1 }
 0x170   :  { %v284_v16 = vadd.f32 %v1170_v49, %v283_v14  ;;  %v285_v17 = vpop.f32.mrb[27].mxu0  ;;  %v364_v18 = vadd.f32 %v1170_v49, %v363_v15  ;;  %v365_v19 = vpop.f32.mrb[27].mxu1  ;;  %v453_v20 = vsel %vm389_vm8, %v279_v4, %v421_v12  ;;  %v469_v23 = vsel %vm405_vm9, %v359_v6, %v437_v13 }
 0x171   :  { %v492_v22 = vmul.f32 %v1177_v56, %v453_v20  ;;  %v508_v34 = vmul.f32 %v1177_v56, %v469_v23 }
 0x172   :  { %v422_v24 = vmul.f32 0.1, %v284_v16  ;;  %v438_v25 = vmul.f32 0.1, %v364_v18  ;;  %vm390_vm10 = vcmp.gt.f32.partialorder %v284_v16, 0.0  ;;  %vm406_vm11 = vcmp.gt.f32.partialorder %v364_v18, 0.0 }
 0x173   :  { %v288_v26 = vpop.f32.mrb[28].mxu0  ;;  %566 = vadd.xlane.f32.xlu1 %v507_v21  ;;  %536 = vadd.xlane.f32.xlu0 %v492_v22  ;;  %v368_v27 = vpop.f32.mrb[28].mxu1 }
 0x174   :  { %v289_v28 = vadd.f32 %v1170_v49, %v288_v26  ;;  %v290_v29 = vpop.f32.mrb[29].mxu0  ;;  %v369_v30 = vadd.f32 %v1170_v49, %v368_v27  ;;  %v370_v31 = vpop.f32.mrb[29].mxu1  ;;  %v454_v32 = vsel %vm390_vm10, %v284_v16, %v422_v24  ;;  %v470_v35 = vsel %vm406_vm11, %v364_v18, %v438_v25 }
 0x175   :  { %v493_v33 = vmul.f32 %v1177_v56, %v454_v32  ;;  %v509_v45 = vmul.f32 %v1177_v56, %v470_v35 }
 0x176   :  { %v423_v36 = vmul.f32 0.1, %v289_v28  ;;  %v439_v37 = vmul.f32 0.1, %v369_v30  ;;  %vm391_vm12 = vcmp.gt.f32.partialorder %v289_v28, 0.0  ;;  %vm407_vm13 = vcmp.gt.f32.partialorder %v369_v30, 0.0 }
 0x177   :  { %v293_v38 = vpop.f32.mrb[30].mxu0  ;;  %538 = vadd.xlane.f32.xlu1 %v493_v33  ;;  %568 = vadd.xlane.f32.xlu0 %v508_v34  ;;  %v373_v39 = vpop.f32.mrb[30].mxu1 }
 0x178   :  { %v294_v40 = vadd.f32 %v1170_v49, %v293_v38  ;;  %v295_v41 = vpop.f32.mrb[31].mxu0  ;;  %v374_v42 = vadd.f32 %v1170_v49, %v373_v39  ;;  %v375_v43 = vpop.f32.mrb[31].mxu1  ;;  %v455_v44 = vsel %vm391_vm12, %v289_v28, %v423_v36  ;;  %v471_v47 = vsel %vm407_vm13, %v369_v30, %v439_v37 }
 0x179   :  { %v494_v46 = vmul.f32 %v1177_v56, %v455_v44  ;;  %v510_v54 = vmul.f32 %v1177_v56, %v471_v47 }
 0x17a   :  { %v424_v48 = vmul.f32 0.1, %v294_v40  ;;  %v440_v50 = vmul.f32 0.1, %v374_v42  ;;  %vm392_vm14 = vcmp.gt.f32.partialorder %v294_v40, 0.0  ;;  %vm408_vm15 = vcmp.gt.f32.partialorder %v374_v42, 0.0 }
 0x17b   :  { %570 = vadd.xlane.f32.xlu1 %v509_v45  ;;  %540 = vadd.xlane.f32.xlu0 %v494_v46 }
 0x17c   :  { %v456_v51 = vsel %vm392_vm14, %v294_v40, %v424_v48  ;;  %v472_v52 = vsel %vm408_vm15, %v374_v42, %v440_v50 }
 0x17d   :  { %v495_v53 = vmul.f32 %v1177_v56, %v456_v51  ;;  %v511_v49 = vmul.f32 %v1177_v56, %v472_v52 }
 0x17f   :  { %542 = vadd.xlane.f32.xlu1 %v495_v53  ;;  %572 = vadd.xlane.f32.xlu0 %v510_v54 }
 0x183   :  { %574 = vadd.xlane.f32.xlu1 %v511_v49 }
 0x1d0   :  { %v513_v57 = vpop.xlane.xlu0 %512 }
 0x1d1   :  { %v578_v58 = vadd.f32 %v1244_v55, %v513_v57 }
 0x1d3   :  { %v610_v59 = vsub.f32 0.0, %v578_v58 }
 0x1d4   :  { %v547_v60 = vpop.xlane.xlu1 %546  ;;  %v545_v61 = vpop.xlane.xlu0 %544 }
 0x1d5   :  { %v642_v62 = vmul.f32 1.442695, %v610_v59  ;;  %v595_v63 = vadd.f32 %v1244_v55, %v547_v60  ;;  %v594_v0 = vadd.f32 %v1244_v55, %v545_v61 }
 0x1d7   :  { %898 = vpow2.f32 %v642_v62  ;;  %v627_v56 = vsub.f32 0.0, %v595_v63  ;;  %v626_v1 = vsub.f32 0.0, %v594_v0 }
 0x1d8   :  { %v517_v2 = vpop.xlane.xlu1 %516  ;;  %v515_v3 = vpop.xlane.xlu0 %514 }
 0x1d9   :  { %v676_v4 = vmul.f32 1.442695, %v627_v56  ;;  %v674_v5 = vmul.f32 1.442695, %v626_v1  ;;  %v580_v6 = vadd.f32 %v1244_v55, %v517_v2  ;;  %v579_v7 = vadd.f32 %v1244_v55, %v515_v3 }
 0x1db   :  { %900 = vpow2.f32 %v676_v4  ;;  %v612_v8 = vsub.f32 0.0, %v580_v6  ;;  %v611_v9 = vsub.f32 0.0, %v579_v7 }
 0x1dc   :  { %902 = vpow2.f32 %v674_v5  ;;  %v519_v10 = vpop.xlane.xlu1 %518  ;;  %v549_v11 = vpop.xlane.xlu0 %548 }
 0x1dd   :  { %v646_v12 = vmul.f32 1.442695, %v612_v8  ;;  %v644_v13 = vmul.f32 1.442695, %v611_v9  ;;  %v581_v14 = vadd.f32 %v1244_v55, %v519_v10  ;;  %v596_v15 = vadd.f32 %v1244_v55, %v549_v11 }
 0x1df   :  { %904 = vpow2.f32 %v646_v12  ;;  %v613_v16 = vsub.f32 0.0, %v581_v14  ;;  %v628_v17 = vsub.f32 0.0, %v596_v15 }
 0x1e0   :  { %906 = vpow2.f32 %v644_v13  ;;  %v551_v18 = vpop.xlane.xlu1 %550  ;;  %v521_v19 = vpop.xlane.xlu0 %520 }
 0x1e1   :  { %v899_v20 = vpop.eup %898  ;;  %v648_v21 = vmul.f32 1.442695, %v613_v16  ;;  %v678_v22 = vmul.f32 1.442695, %v628_v17  ;;  %v597_v23 = vadd.f32 %v1244_v55, %v551_v18  ;;  %v582_v24 = vadd.f32 %v1244_v55, %v521_v19 }
 0x1e2   :  { %v706_v25 = vadd.f32 1.0, %v899_v20 }
 0x1e3   :  { %908 = vpow2.f32 %v648_v21  ;;  %v629_v26 = vsub.f32 0.0, %v597_v23  ;;  %v614_v27 = vsub.f32 0.0, %v582_v24 }
 0x1e4   :  { %910 = vrcp.f32 %v706_v25  ;;  %v523_v28 = vpop.xlane.xlu1 %522  ;;  %v553_v29 = vpop.xlane.xlu0 %552 }
 0x1e5   :  { %v901_v30 = vpop.eup %900  ;;  %912 = vpow2.f32 %v678_v22  ;;  %v680_v31 = vmul.f32 1.442695, %v629_v26  ;;  %v583_v32 = vadd.f32 %v1244_v55, %v523_v28  ;;  %v650_v35 = vmul.f32 1.442695, %v614_v27 }
 0x1e6   :  { %v903_v33 = vpop.eup %902  ;;  %v723_v34 = vadd.f32 1.0, %v901_v30  ;;  %v598_v36 = vadd.f32 %v1244_v55, %v553_v29 }
 0x1e7   :  { %v722_v37 = vadd.f32 1.0, %v903_v33  ;;  %914 = vpow2.f32 %v680_v31  ;;  %v615_v38 = vsub.f32 0.0, %v583_v32 }
 0x1e8   :  { %916 = vrcp.f32 %v723_v34  ;;  %v630_v39 = vsub.f32 0.0, %v598_v36  ;;  %v555_v40 = vpop.xlane.xlu1 %554  ;;  %v525_v41 = vpop.xlane.xlu0 %524 }
 0x1e9   :  { %v905_v42 = vpop.eup %904  ;;  %918 = vrcp.f32 %v722_v37  ;;  %v652_v43 = vmul.f32 1.442695, %v615_v38  ;;  %v599_v44 = vadd.f32 %v1244_v55, %v555_v40  ;;  %v584_v45 = vadd.f32 %v1244_v55, %v525_v41 }
 0x1ea   :  { %v907_v46 = vpop.eup %906  ;;  %v708_v47 = vadd.f32 1.0, %v905_v42  ;;  %920 = vpow2.f32 %v650_v35  ;;  %v682_v48 = vmul.f32 1.442695, %v630_v39 }
 0x1eb   :  { %v707_v50 = vadd.f32 1.0, %v907_v46  ;;  %922 = vpow2.f32 %v652_v43  ;;  %v631_v51 = vsub.f32 0.0, %v599_v44  ;;  %v616_v52 = vsub.f32 0.0, %v584_v45 }
 0x1ec   :  { %924 = vrcp.f32 %v708_v47  ;;  %v527_v53 = vpop.xlane.xlu1 %526  ;;  %v557_v54 = vpop.xlane.xlu0 %556 }
 0x1ed   :  { %v909_v49 = vpop.eup %908  ;;  %926 = vrcp.f32 %v707_v50  ;;  %v684_v57 = vmul.f32 1.442695, %v631_v51  ;;  %v654_v58 = vmul.f32 1.442695, %v616_v52  ;;  %v585_v59 = vadd.f32 %v1244_v55, %v527_v53 }
 0x1ee   :  { %v911_v60 = vpop.eup %910  ;;  %v709_v61 = vadd.f32 1.0, %v909_v49  ;;  %928 = vpow2.f32 %v682_v48  ;;  %v600_v62 = vadd.f32 %v1244_v55, %v557_v54 }
 0x1ef   :  { %v913_v63 = vpop.eup %912  ;;  %771 = vst.msk [vmem:[%s1411_s5] sm:$0xff] %vm770_vm0, %v911_v60  ;;  %930 = vpow2.f32 %v684_v57  ;;  %v617_v0 = vsub.f32 0.0, %v585_v59 }
 0x1f0   :  { %932 = vrcp.f32 %v709_v61  ;;  %v724_v56 = vadd.f32 1.0, %v913_v63  ;;  %v632_v1 = vsub.f32 0.0, %v600_v62  ;;  %v559_v2 = vpop.xlane.xlu1 %558  ;;  %v529_v3 = vpop.xlane.xlu0 %528 }
 0x1f1   :  { %v915_v4 = vpop.eup %914  ;;  %934 = vpow2.f32 %v654_v58  ;;  %v656_v5 = vmul.f32 1.442695, %v617_v0  ;;  %v601_v6 = vadd.f32 %v1244_v55, %v559_v2  ;;  %v586_v7 = vadd.f32 %v1244_v55, %v529_v3 }
 0x1f2   :  { %v917_v8 = vpop.eup %916  ;;  %936 = vrcp.f32 %v724_v56  ;;  %v725_v9 = vadd.f32 1.0, %v915_v4  ;;  %v686_v10 = vmul.f32 1.442695, %v632_v1 }
 0x1f3   :  { %v919_v11 = vpop.eup %918  ;;  %788 = vst.msk [vmem:[%s1411_s5 + $0x88] sm:$0xff] %vm770_vm0, %v917_v8  ;;  %938 = vpow2.f32 %v656_v5  ;;  %v633_v12 = vsub.f32 0.0, %v601_v6  ;;  %v618_v13 = vsub.f32 0.0, %v586_v7 }
 0x1f4   :  { %v921_v14 = vpop.eup %920  ;;  %787 = vst.msk [vmem:[%s1411_s5 + $0x80] sm:$0xff] %vm770_vm0, %v919_v11  ;;  %940 = vrcp.f32 %v725_v9  ;;  %v531_v15 = vpop.xlane.xlu1 %530 }
 0x1f5   :  { %v561_v16 = vpop.xlane.xlu0 %560  ;;  %v923_v17 = vpop.eup %922  ;;  %v710_v18 = vadd.f32 1.0, %v921_v14  ;;  %942 = vpow2.f32 %v686_v10  ;;  %v688_v19 = vmul.f32 1.442695, %v633_v12  ;;  %v658_v22 = vmul.f32 1.442695, %v618_v13 }
 0x1f6   :  { %v925_v20 = vpop.eup %924  ;;  %v711_v21 = vadd.f32 1.0, %v923_v17  ;;  %v587_v23 = vadd.f32 %v1244_v55, %v531_v15  ;;  %v602_v24 = vadd.f32 %v1244_v55, %v561_v16 }
 0x1f7   :  { %v927_v25 = vpop.eup %926  ;;  %773 = vst.msk [vmem:[%s1411_s5 + $0x10] sm:$0xff] %vm770_vm0, %v925_v20  ;;  %944 = vrcp.f32 %v710_v18 }
 0x1f8   :  { %v929_v26 = vpop.eup %928  ;;  %772 = vst.msk [vmem:[%s1411_s5 + $0x8] sm:$0xff] %vm770_vm0, %v927_v25  ;;  %946 = vrcp.f32 %v711_v21  ;;  %v619_v27 = vsub.f32 0.0, %v587_v23  ;;  %v634_v28 = vsub.f32 0.0, %v602_v24  ;;  %v563_v29 = vpop.xlane.xlu1 %562 }
 0x1f9   :  { %v533_v30 = vpop.xlane.xlu0 %532  ;;  %v931_v31 = vpop.eup %930  ;;  %v726_v32 = vadd.f32 1.0, %v929_v26  ;;  %948 = vpow2.f32 %v688_v19  ;;  %v603_v33 = vadd.f32 %v1244_v55, %v563_v29 }
 0x1fa   :  { %v588_v34 = vadd.f32 %v1244_v55, %v533_v30  ;;  %v933_v35 = vpop.eup %932  ;;  %v727_v36 = vadd.f32 1.0, %v931_v31  ;;  %950 = vpow2.f32 %v658_v22  ;;  %v660_v37 = vmul.f32 1.442695, %v619_v27 }
 0x1fb   :  { %v935_v38 = vpop.eup %934  ;;  %774 = vst.msk [vmem:[%s1411_s5 + $0x18] sm:$0xff] %vm770_vm0, %v933_v35  ;;  %952 = vrcp.f32 %v726_v32  ;;  %v690_v39 = vmul.f32 1.442695, %v634_v28  ;;  %v635_v40 = vsub.f32 0.0, %v603_v33 }
 0x1fc   :  { %v620_v41 = vsub.f32 0.0, %v588_v34  ;;  %v937_v42 = vpop.eup %936  ;;  %954 = vrcp.f32 %v727_v36  ;;  %v712_v43 = vadd.f32 1.0, %v935_v38  ;;  %v535_v44 = vpop.xlane.xlu1 %534 }
 0x1fd   :  { %v565_v45 = vpop.xlane.xlu0 %564  ;;  %v939_v46 = vpop.eup %938  ;;  %789 = vst.msk [vmem:[%s1411_s5 + $0x90] sm:$0xff] %vm770_vm0, %v937_v42  ;;  %956 = vpow2.f32 %v660_v37  ;;  %v692_v47 = vmul.f32 1.442695, %v635_v40  ;;  %v589_v48 = vadd.f32 %v1244_v55, %v535_v44 }
 0x1fe   :  { %v941_v50 = vpop.eup %940  ;;  %958 = vrcp.f32 %v712_v43  ;;  %v713_v51 = vadd.f32 1.0, %v939_v46  ;;  %v604_v52 = vadd.f32 %v1244_v55, %v565_v45  ;;  %v662_v54 = vmul.f32 1.442695, %v620_v41 }
 0x1ff   :  { %v943_v53 = vpop.eup %942  ;;  %790 = vst.msk [vmem:[%s1411_s5 + $0x98] sm:$0xff] %vm770_vm0, %v941_v50  ;;  %960 = vpow2.f32 %v690_v39  ;;  %v621_v49 = vsub.f32 0.0, %v589_v48 }
 0x200   :  { %962 = vrcp.f32 %v713_v51  ;;  %v728_v57 = vadd.f32 1.0, %v943_v53  ;;  %v636_v58 = vsub.f32 0.0, %v604_v52  ;;  %v567_v59 = vpop.xlane.xlu1 %566 }
 0x201   :  { %v537_v60 = vpop.xlane.xlu0 %536  ;;  %v945_v61 = vpop.eup %944  ;;  %964 = vpow2.f32 %v692_v47  ;;  %v664_v62 = vmul.f32 1.442695, %v621_v49  ;;  %v605_v63 = vadd.f32 %v1244_v55, %v567_v59 }
 0x202   :  { %v590_v0 = vadd.f32 %v1244_v55, %v537_v60  ;;  %v947_v56 = vpop.eup %946  ;;  %775 = vst.msk [vmem:[%s1411_s5 + $0x20] sm:$0xff] %vm770_vm0, %v945_v61  ;;  %966 = vrcp.f32 %v728_v57  ;;  %v694_v1 = vmul.f32 1.442695, %v636_v58 }
 0x203   :  { %v949_v2 = vpop.eup %948  ;;  %776 = vst.msk [vmem:[%s1411_s5 + $0x28] sm:$0xff] %vm770_vm0, %v947_v56  ;;  %968 = vpow2.f32 %v662_v54  ;;  %v637_v3 = vsub.f32 0.0, %v605_v63 }
 0x204   :  { %v622_v4 = vsub.f32 0.0, %v590_v0  ;;  %v951_v5 = vpop.eup %950  ;;  %v729_v6 = vadd.f32 1.0, %v949_v2  ;;  %970 = vpow2.f32 %v664_v62  ;;  %v539_v7 = vpop.xlane.xlu1 %538 }
 0x205   :  { %v569_v8 = vpop.xlane.xlu0 %568  ;;  %v953_v9 = vpop.eup %952  ;;  %v714_v10 = vadd.f32 1.0, %v951_v5  ;;  %972 = vpow2.f32 %v694_v1  ;;  %v696_v11 = vmul.f32 1.442695, %v637_v3  ;;  %v591_v14 = vadd.f32 %v1244_v55, %v539_v7 }
 0x206   :  { %v666_v12 = vmul.f32 1.442695, %v622_v4  ;;  %v955_v13 = vpop.eup %954  ;;  %791 = vst.msk [vmem:[%s1411_s5 + $0xa0] sm:$0xff] %vm770_vm0, %v953_v9  ;;  %974 = vrcp.f32 %v729_v6  ;;  %v606_v15 = vadd.f32 %v1244_v55, %v569_v8 }
 0x207   :  { %v957_v16 = vpop.eup %956  ;;  %792 = vst.msk [vmem:[%s1411_s5 + $0xa8] sm:$0xff] %vm770_vm0, %v955_v13  ;;  %976 = vrcp.f32 %v714_v10  ;;  %v623_v19 = vsub.f32 0.0, %v591_v14 }
 0x208   :  { %v959_v17 = vpop.eup %958  ;;  %v715_v18 = vadd.f32 1.0, %v957_v16  ;;  %978 = vpow2.f32 %v696_v11  ;;  %v638_v20 = vsub.f32 0.0, %v606_v15  ;;  %v571_v21 = vpop.xlane.xlu1 %570 }
 0x209   :  { %v541_v22 = vpop.xlane.xlu0 %540  ;;  %v961_v23 = vpop.eup %960  ;;  %777 = vst.msk [vmem:[%s1411_s5 + $0x30] sm:$0xff] %vm770_vm0, %v959_v17  ;;  %980 = vpow2.f32 %v666_v12  ;;  %v607_v24 = vadd.f32 %v1244_v55, %v571_v21  ;;  %v668_v28 = vmul.f32 1.442695, %v623_v19 }
 0x20a   :  { %v592_v25 = vadd.f32 %v1244_v55, %v541_v22  ;;  %v963_v26 = vpop.eup %962  ;;  %982 = vrcp.f32 %v715_v18  ;;  %v730_v27 = vadd.f32 1.0, %v961_v23  ;;  %v698_v30 = vmul.f32 1.442695, %v638_v20 }
 0x20b   :  { %v965_v29 = vpop.eup %964  ;;  %778 = vst.msk [vmem:[%s1411_s5 + $0x38] sm:$0xff] %vm770_vm0, %v963_v26  ;;  %v639_v31 = vsub.f32 0.0, %v607_v24 }
 0x20c   :  { %v967_v32 = vpop.eup %966  ;;  %984 = vrcp.f32 %v730_v27  ;;  %v731_v33 = vadd.f32 1.0, %v965_v29  ;;  %v624_v34 = vsub.f32 0.0, %v592_v25  ;;  %v543_v35 = vpop.xlane.xlu1 %542 }
 0x20d   :  { %v573_v36 = vpop.xlane.xlu0 %572  ;;  %v969_v37 = vpop.eup %968  ;;  %793 = vst.msk [vmem:[%s1411_s5 + $0xb0] sm:$0xff] %vm770_vm0, %v967_v32  ;;  %986 = vpow2.f32 %v668_v28  ;;  %v593_v38 = vadd.f32 %v1244_v55, %v543_v35  ;;  %v700_v44 = vmul.f32 1.442695, %v639_v31 }
 0x20e   :  { %v971_v39 = vpop.eup %970  ;;  %988 = vrcp.f32 %v731_v33  ;;  %v716_v40 = vadd.f32 1.0, %v969_v37  ;;  %v608_v41 = vadd.f32 %v1244_v55, %v573_v36  ;;  %v670_v48 = vmul.f32 1.442695, %v624_v34 }
 0x20f   :  { %v973_v42 = vpop.eup %972  ;;  %v717_v43 = vadd.f32 1.0, %v971_v39  ;;  %990 = vpow2.f32 %v698_v30  ;;  %v625_v45 = vsub.f32 0.0, %v593_v38 }
 0x210   :  { %v975_v46 = vpop.eup %974  ;;  %992 = vrcp.f32 %v716_v40  ;;  %v732_v47 = vadd.f32 1.0, %v973_v42  ;;  %v640_v50 = vsub.f32 0.0, %v608_v41  ;;  %v575_v51 = vpop.xlane.xlu1 %574 }
 0x211   :  { %v977_v52 = vpop.eup %976  ;;  %794 = vst.msk [vmem:[%s1411_s5 + $0xb8] sm:$0xff] %vm770_vm0, %v975_v46  ;;  %994 = vrcp.f32 %v717_v43  ;;  %v609_v53 = vadd.f32 %v1244_v55, %v575_v51  ;;  %v672_v58 = vmul.f32 1.442695, %v625_v45 }
 0x212   :  { %v979_v54 = vpop.eup %978  ;;  %779 = vst.msk [vmem:[%s1411_s5 + $0x40] sm:$0xff] %vm770_vm0, %v977_v52  ;;  %996 = vrcp.f32 %v732_v47  ;;  %v702_v62 = vmul.f32 1.442695, %v640_v50 }
 0x213   :  { %v981_v49 = vpop.eup %980  ;;  %v733_v57 = vadd.f32 1.0, %v979_v54  ;;  %998 = vpow2.f32 %v700_v44  ;;  %v641_v59 = vsub.f32 0.0, %v609_v53 }
 0x214   :  { %v983_v60 = vpop.eup %982  ;;  %v718_v61 = vadd.f32 1.0, %v981_v49  ;;  %1000 = vpow2.f32 %v670_v48 }
 0x215   :  { %780 = vst.msk [vmem:[%s1411_s5 + $0x48] sm:$0xff] %vm770_vm0, %v983_v60  ;;  %1002 = vrcp.f32 %v733_v57  ;;  %v704_v55 = vmul.f32 1.442695, %v641_v59 }
 0x216   :  { %v985_v63 = vpop.eup %984  ;;  %1004 = vrcp.f32 %v718_v61 }
 0x217   :  { %v987_v0 = vpop.eup %986  ;;  %795 = vst.msk [vmem:[%s1411_s5 + $0xc0] sm:$0xff] %vm770_vm0, %v985_v63  ;;  %1006 = vpow2.f32 %v672_v58 }
 0x218   :  { %v989_v56 = vpop.eup %988  ;;  %v719_v1 = vadd.f32 1.0, %v987_v0  ;;  %1008 = vpow2.f32 %v702_v62 }
 0x219   :  { %v991_v2 = vpop.eup %990  ;;  %796 = vst.msk [vmem:[%s1411_s5 + $0xc8] sm:$0xff] %vm770_vm0, %v989_v56  ;;  %1010 = vpow2.f32 %v704_v55 }
 0x21a   :  { %v993_v3 = vpop.eup %992  ;;  %1012 = vrcp.f32 %v719_v1  ;;  %v734_v4 = vadd.f32 1.0, %v991_v2 }
 0x21b   :  { %v995_v5 = vpop.eup %994  ;;  %781 = vst.msk [vmem:[%s1411_s5 + $0x50] sm:$0xff] %vm770_vm0, %v993_v3 }
 0x21c   :  { %v997_v6 = vpop.eup %996  ;;  %782 = vst.msk [vmem:[%s1411_s5 + $0x58] sm:$0xff] %vm770_vm0, %v995_v5  ;;  %1014 = vrcp.f32 %v734_v4 }
 0x21d   :  { %v999_v7 = vpop.eup %998  ;;  %797 = vst.msk [vmem:[%s1411_s5 + $0xd0] sm:$0xff] %vm770_vm0, %v997_v6 }
 0x21e   :  { %v1001_v8 = vpop.eup %1000  ;;  %v735_v9 = vadd.f32 1.0, %v999_v7 }
 0x21f   :  { %v1003_v10 = vpop.eup %1002  ;;  %v720_v11 = vadd.f32 1.0, %v1001_v8 }
 0x220   :  { %v1005_v12 = vpop.eup %1004  ;;  %798 = vst.msk [vmem:[%s1411_s5 + $0xd8] sm:$0xff] %vm770_vm0, %v1003_v10  ;;  %1016 = vrcp.f32 %v735_v9 }
 0x221   :  { %v1007_v13 = vpop.eup %1006  ;;  %783 = vst.msk [vmem:[%s1411_s5 + $0x60] sm:$0xff] %vm770_vm0, %v1005_v12  ;;  %1018 = vrcp.f32 %v720_v11 }
 0x222   :  { %v1009_v14 = vpop.eup %1008  ;;  %v721_v15 = vadd.f32 1.0, %v1007_v13 }
 0x223   :  { %v1011_v16 = vpop.eup %1010  ;;  %v736_v17 = vadd.f32 1.0, %v1009_v14 }
 0x224   :  { %v1013_v18 = vpop.eup %1012  ;;  %1020 = vrcp.f32 %v721_v15  ;;  %v737_v19 = vadd.f32 1.0, %v1011_v16 }
 0x225   :  { %784 = vst.msk [vmem:[%s1411_s5 + $0x68] sm:$0xff] %vm770_vm0, %v1013_v18  ;;  %1022 = vrcp.f32 %v736_v17 }
 0x226   :  { %v1015_v20 = vpop.eup %1014  ;;  %1024 = vrcp.f32 %v737_v19 }
 0x227   :  { %799 = vst.msk [vmem:[%s1411_s5 + $0xe0] sm:$0xff] %vm770_vm0, %v1015_v20 }
 0x22a   :  { %v1017_v21 = vpop.eup %1016 }
 0x22b   :  { %v1019_v22 = vpop.eup %1018  ;;  %800 = vst.msk [vmem:[%s1411_s5 + $0xe8] sm:$0xff] %vm770_vm0, %v1017_v21 }
 0x22c   :  { %785 = vst.msk [vmem:[%s1411_s5 + $0x70] sm:$0xff] %vm770_vm0, %v1019_v22 }
 0x22e   :  { %v1021_v23 = vpop.eup %1020 }
 0x22f   :  { %v1023_v24 = vpop.eup %1022  ;;  %786 = vst.msk [vmem:[%s1411_s5 + $0x78] sm:$0xff] %vm770_vm0, %v1021_v23 }
 0x230   :  { %v1025_v25 = vpop.eup %1024  ;;  %801 = vst.msk [vmem:[%s1411_s5 + $0xf0] sm:$0xff] %vm770_vm0, %v1023_v24 }
 0x231   :  { %802 = vst.msk [vmem:[%s1411_s5 + $0xf8] sm:$0xff] %vm770_vm0, %v1025_v25 }
 0x232   :  { %807 = vsyncpa [#allocation4], 1 }
 0x233   :  { %808 = vsyncpa [#allocation6], 1 }

</bundles_post_ra>
